<compile_context>
chip_gen: v6e
topology: v6e:2x2x1
jax: 0.10.0
libtpu: 0.0.40
codegen_flags: <defaults>
</compile_context>

<pallas_src>
import jax
import jax.numpy as jnp
from jax import lax
from jax.experimental import pallas as pl
from jax.experimental.pallas import tpu as pltpu

# small, deterministic synthetic configuration
NUM_MODELS = 3        # len(models)
ABILITY_DIM = 4       # ability_dim
FEATURE_DIM = 16      # feature_dim
NUM_CLASSES = 10      # base-model output dim
HIDDEN1 = 64
HIDDEN2 = 32
BACKBONE_DIM = 2048   # resnet50 penultimate feature size
B, C_IN, H, W = 2, 3, 16, 16
D_IN = C_IN * H * W   # 768 (lane-aligned)
OUT_COLS = 128        # lane-dense output tile; sliced to NUM_CLASSES outside


def ensemble_kernel(x_ref, feat_ref, ability_ref,
                    fcw_ref, fcb_ref,
                    w1f_ref, w1a_ref, b1_ref,
                    w2_ref, b2_ref,
                    w3_ref, b3_ref,
                    mw_ref, mb_ref,
                    out_ref):
    f32 = jnp.float32
    tb = x_ref.shape[0]
    num_models = w3_ref.shape[1]
    num_classes = mw_ref.shape[0] // num_models
    contract_last = (((1,), (1,)), ((), ()))   # A @ B.T (both contract on last dim)

    # --- feature_extractor.fc : Linear(2048 -> feature_dim) ------------------
    # bf16 operands, lane-dense weight (F, 2048), f32 accumulation.
    sample_feature = (lax.dot_general(feat_ref[...], fcw_ref[...], contract_last,
                                      preferred_element_type=f32)
                      + fcb_ref[...])                                  # (TB, F)

    # --- ability vector vstacked over the batch -------------------------------
    ability = jnp.broadcast_to(ability_ref[...],
                               (tb, ability_ref.shape[1]))             # (TB, A*M)

    # --- gating MLP: Linear -> ReLU -> (Dropout) -> Linear -> ReLU
    #                 -> (Dropout) -> Linear -> Softmax(dim=1)
    # reference concatenates [sample_feature, ability], so
    # cat([f, a]) @ W1 == f @ W1[:F] + a @ W1[F:]
    h1 = (jnp.dot(sample_feature, w1f_ref[...], preferred_element_type=f32)
          + jnp.dot(ability, w1a_ref[...], preferred_element_type=f32)
          + b1_ref[...])
    h1 = jnp.maximum(h1, 0.0)
    # TODO(synk): Dropout(0.5) treated as identity (eval/inference semantics).

    h2 = jnp.dot(h1, w2_ref[...], preferred_element_type=f32) + b2_ref[...]
    h2 = jnp.maximum(h2, 0.0)

    logits = jnp.dot(h2, w3_ref[...], preferred_element_type=f32) + b3_ref[...]
    logits = logits - jnp.max(logits, axis=1, keepdims=True)
    e = jnp.exp(logits)
    denom = jnp.sum(e, axis=1, keepdims=True)
    weight = e * pl.reciprocal(denom, approx=True)                     # (TB, M)

    # --- base models fused into ONE GEMM: (TB, D_IN) @ (M*C, D_IN)^T ----------
    # TODO(synk): original base models are arbitrary nn.Modules; represented
    # here as linear classifiers over the flattened input.
    fused = (lax.dot_general(x_ref[...], mw_ref[...], contract_last,
                             preferred_element_type=f32)
             + mb_ref[...])                                            # (TB, M*C)

    # ability-weighted combine  (== torch.bmm(outputs, weight).squeeze(2))
    acc = weight[:, 0:1] * fused[:, 0:num_classes]
    for m in range(1, num_models):                   # static unroll, M is small
        acc = acc + (weight[:, m:m + 1]
                     * fused[:, m * num_classes:(m + 1) * num_classes])

    # lane-dense store: zero-pad class dim to the 128-wide output tile so the
    # store is a single full-width, unmasked vst.
    pad = out_ref.shape[1] - num_classes
    out_ref[...] = jnp.concatenate([acc, jnp.zeros((tb, pad), f32)], axis=1)


def ability_weighted_ensemble(x, backbone_feat, theta, params):
    batch = x.shape[0]
    # MXU inputs in bf16 (accumulation stays f32 inside the kernel)
    x_flat = x.reshape(batch, -1).astype(jnp.bfloat16)
    feat = backbone_feat.astype(jnp.bfloat16)
    ability = theta.reshape(1, -1).astype(jnp.float32)   # theta.weight.reshape(-1)

    # batch tile: sublane-aligned, pad the batch up to a multiple of it
    tb = 128 if batch >= 128 else max(8, ((batch + 7) // 8) * 8)
    b_pad = ((batch + tb - 1) // tb) * tb
    if b_pad != batch:
        x_flat = jnp.pad(x_flat, ((0, b_pad - batch), (0, 0)))
        feat = jnp.pad(feat, ((0, b_pad - batch), (0, 0)))

    weights = (params['fc_w'], params['fc_b'],
               params['w1f'], params['w1a'], params['b1'],
               params['w2'], params['b2'],
               params['w3'], params['b3'],
               params['mw'], params['mb'])

    # weights: full-array blocks, broadcast (block index (0,0)) to every step
    def full_spec(a):
        return pl.BlockSpec(a.shape, lambda i: (0, 0))

    grid_spec = pltpu.PrefetchScalarGridSpec(
        num_scalar_prefetch=0,
        grid=(b_pad // tb,),
        in_specs=[pl.BlockSpec((tb, x_flat.shape[1]), lambda i: (i, 0)),
                  pl.BlockSpec((tb, feat.shape[1]), lambda i: (i, 0)),
                  full_spec(ability)] + [full_spec(w) for w in weights],
        out_specs=pl.BlockSpec((tb, OUT_COLS), lambda i: (i, 0)),
    )

    out_full = pl.pallas_call(
        ensemble_kernel,
        out_shape=jax.ShapeDtypeStruct((b_pad, OUT_COLS), jnp.float32),
        grid_spec=grid_spec,
        compiler_params=pltpu.CompilerParams(
            dimension_semantics=("parallel",)),
    )(x_flat, feat, ability, *weights)

    return out_full[:batch, :NUM_CLASSES]


def reference_forward(x, backbone_feat, theta, params):
    """Pure-JAX reference with the same bf16 operand casts as the kernel."""
    f32 = jnp.float32
    batch = x.shape[0]
    x_flat = x.reshape(batch, -1).astype(jnp.bfloat16)
    feat = backbone_feat.astype(jnp.bfloat16)

    sample_feature = (jnp.dot(feat, params['fc_w'].T, preferred_element_type=f32)
                      + params['fc_b'])
    ability = jnp.broadcast_to(theta.reshape(1, -1).astype(f32),
                               (batch, ABILITY_DIM * NUM_MODELS))
    h1 = jnp.maximum(jnp.dot(sample_feature, params['w1f'])
                     + jnp.dot(ability, params['w1a']) + params['b1'], 0.0)
    h2 = jnp.maximum(jnp.dot(h1, params['w2']) + params['b2'], 0.0)
    logits = jnp.dot(h2, params['w3']) + params['b3']
    weight = jax.nn.softmax(logits, axis=1)                            # (B, M)

    fused = (jnp.dot(x_flat, params['mw'].T, preferred_element_type=f32)
             + params['mb'])                                           # (B, M*C)
    outs = fused.reshape(batch, NUM_MODELS, NUM_CLASSES)               # (B, M, C)
    return jnp.einsum('bmc,bm->bc', outs, weight)


def init_params(key):
    ks = jax.random.split(key, 10)
    s = lambda fan_in: 1.0 / jnp.sqrt(jnp.float32(fan_in))
    p = {
        # feature_extractor.fc : Linear(2048, feature_dim)
        # stored lane-dense (feature_dim, 2048), bf16 for HBM/MXU
        'fc_w': (jax.random.normal(ks[0], (FEATURE_DIM, BACKBONE_DIM), jnp.float32)
                 * s(BACKBONE_DIM)).astype(jnp.bfloat16),
        'fc_b': jnp.zeros((1, FEATURE_DIM), jnp.float32),
        # mlp Linear(feature_dim + ability_dim*M, 64), split into feature/ability halves
        'w1f': jax.random.normal(ks[1], (FEATURE_DIM, HIDDEN1), jnp.float32)
               * s(FEATURE_DIM + ABILITY_DIM * NUM_MODELS),
        'w1a': jax.random.normal(ks[2], (ABILITY_DIM * NUM_MODELS, HIDDEN1), jnp.float32)
               * s(FEATURE_DIM + ABILITY_DIM * NUM_MODELS),
        'b1': jnp.zeros((1, HIDDEN1), jnp.float32),
        # mlp Linear(64, 32)
        'w2': jax.random.normal(ks[3], (HIDDEN1, HIDDEN2), jnp.float32) * s(HIDDEN1),
        'b2': jnp.zeros((1, HIDDEN2), jnp.float32),
        # mlp Linear(32, num_models)
        'w3': jax.random.normal(ks[4], (HIDDEN2, NUM_MODELS), jnp.float32) * s(HIDDEN2),
        'b3': jnp.zeros((1, NUM_MODELS), jnp.float32),
        # base ensemble models fused along the class axis, lane-dense (M*C, D_IN), bf16
        'mw': (jax.random.normal(ks[5], (NUM_MODELS * NUM_CLASSES, D_IN), jnp.float32)
               * s(D_IN)).astype(jnp.bfloat16),
        'mb': jnp.zeros((1, NUM_MODELS * NUM_CLASSES), jnp.float32),
    }
    return p


if __name__ == "__main__":
    key = jax.random.PRNGKey(0)
    k_x, k_feat, k_theta, k_params = jax.random.split(key, 4)

    # x: NCHW image batch
    x = jax.random.normal(k_x, (B, C_IN, H, W), jnp.float32)

    # synthetic stand-in for the resnet50 penultimate 2048-d feature
    backbone_feat = jax.random.normal(k_feat, (B, BACKBONE_DIM), jnp.float32) * 0.1

    # cdm.irt_net.theta.weight  (ability vector, reshape(-1) -> ability_dim * M)
    theta = jax.random.normal(k_theta, (NUM_MODELS, ABILITY_DIM), jnp.float32)

    params = init_params(k_params)

    out = ability_weighted_ensemble(x, backbone_feat, theta, params)
    out = jax.block_until_ready(out)
    assert out.shape == (B, NUM_CLASSES), out.shape
    assert bool(jnp.all(jnp.isfinite(out)))

    ref = jax.block_until_ready(reference_forward(x, backbone_feat, theta, params))
    assert bool(jnp.allclose(out, ref, rtol=5e-2, atol=5e-2)), (out, ref)

    print("KERNEL_OK")
</pallas_src>

<mosaic_0001>
module attributes {stable_mosaic.version = 11 : i64} {
  func.func @ensemble_kernel(%arg0: i32, %arg1: memref<8x768xbf16, #tpu.memory_space<vmem>>, %arg2: memref<8x2048xbf16, #tpu.memory_space<vmem>>, %arg3: memref<1x12xf32, #tpu.memory_space<vmem>>, %arg4: memref<16x2048xbf16, #tpu.memory_space<vmem>>, %arg5: memref<1x16xf32, #tpu.memory_space<vmem>>, %arg6: memref<16x64xf32, #tpu.memory_space<vmem>>, %arg7: memref<12x64xf32, #tpu.memory_space<vmem>>, %arg8: memref<1x64xf32, #tpu.memory_space<vmem>>, %arg9: memref<64x32xf32, #tpu.memory_space<vmem>>, %arg10: memref<1x32xf32, #tpu.memory_space<vmem>>, %arg11: memref<32x3xf32, #tpu.memory_space<vmem>>, %arg12: memref<1x3xf32, #tpu.memory_space<vmem>>, %arg13: memref<30x768xbf16, #tpu.memory_space<vmem>>, %arg14: memref<1x30xf32, #tpu.memory_space<vmem>>, %arg15: memref<8x128xf32, #tpu.memory_space<vmem>>) attributes {dimension_semantics = [#tpu.dimension_semantics<parallel>], iteration_bounds = array<i64: 1>, scalar_prefetch = 0 : i64, scratch_operands = 0 : i64, tpu.core_type = #tpu.core_type<tc>, window_params = [{transform_indices = @transform_0, window_bounds = array<i64: 8, 768>}, {transform_indices = @transform_1, window_bounds = array<i64: 8, 2048>}, {pipeline_mode = #tpu.pipeline_mode<synchronous>, transform_indices = @transform_2, window_bounds = array<i64: 1, 12>}, {pipeline_mode = #tpu.pipeline_mode<synchronous>, transform_indices = @transform_3, window_bounds = array<i64: 16, 2048>}, {pipeline_mode = #tpu.pipeline_mode<synchronous>, transform_indices = @transform_4, window_bounds = array<i64: 1, 16>}, {pipeline_mode = #tpu.pipeline_mode<synchronous>, transform_indices = @transform_5, window_bounds = array<i64: 16, 64>}, {pipeline_mode = #tpu.pipeline_mode<synchronous>, transform_indices = @transform_6, window_bounds = array<i64: 12, 64>}, {pipeline_mode = #tpu.pipeline_mode<synchronous>, transform_indices = @transform_7, window_bounds = array<i64: 1, 64>}, {pipeline_mode = #tpu.pipeline_mode<synchronous>, transform_indices = @transform_8, window_bounds = array<i64: 64, 32>}, {pipeline_mode = #tpu.pipeline_mode<synchronous>, transform_indices = @transform_9, window_bounds = array<i64: 1, 32>}, {pipeline_mode = #tpu.pipeline_mode<synchronous>, transform_indices = @transform_10, window_bounds = array<i64: 32, 3>}, {pipeline_mode = #tpu.pipeline_mode<synchronous>, transform_indices = @transform_11, window_bounds = array<i64: 1, 3>}, {pipeline_mode = #tpu.pipeline_mode<synchronous>, transform_indices = @transform_12, window_bounds = array<i64: 30, 768>}, {pipeline_mode = #tpu.pipeline_mode<synchronous>, transform_indices = @transform_13, window_bounds = array<i64: 1, 30>}, {transform_indices = @transform_14, window_bounds = array<i64: 8, 128>}]} {
    %c0 = arith.constant 0 : index
    %c0_0 = arith.constant 0 : index
    %0 = vector.load %arg2[%c0, %c0_0] : memref<8x2048xbf16, #tpu.memory_space<vmem>>, vector<8x2048xbf16>
    %c0_1 = arith.constant 0 : index
    %c0_2 = arith.constant 0 : index
    %1 = vector.load %arg4[%c0_1, %c0_2] : memref<16x2048xbf16, #tpu.memory_space<vmem>>, vector<16x2048xbf16>
    %cst = arith.constant dense<0.000000e+00> : vector<8x16xf32>
    %2 = tpu.matmul %0, %1, %cst {dimension_numbers = #tpu.dot_dimension_numbers<[1], [1], [0], [0], [0, 0, 1, 0], [], []>} : vector<8x2048xbf16>, vector<16x2048xbf16>, vector<8x16xf32> -> vector<8x16xf32>
    %c0_3 = arith.constant 0 : index
    %c0_4 = arith.constant 0 : index
    %3 = vector.load %arg5[%c0_3, %c0_4] : memref<1x16xf32, #tpu.memory_space<vmem>>, vector<1x16xf32>
    %4 = vector.broadcast %3 : vector<1x16xf32> to vector<8x16xf32>
    %5 = arith.addf %2, %4 : vector<8x16xf32>
    %c0_5 = arith.constant 0 : index
    %c0_6 = arith.constant 0 : index
    %6 = vector.load %arg3[%c0_5, %c0_6] : memref<1x12xf32, #tpu.memory_space<vmem>>, vector<1x12xf32>
    %7 = vector.shape_cast %6 : vector<1x12xf32> to vector<1x12xf32>
    %8 = vector.broadcast %7 : vector<1x12xf32> to vector<8x12xf32>
    %c0_7 = arith.constant 0 : index
    %c0_8 = arith.constant 0 : index
    %9 = vector.load %arg6[%c0_7, %c0_8] : memref<16x64xf32, #tpu.memory_space<vmem>>, vector<16x64xf32>
    %cst_9 = arith.constant dense<0.000000e+00> : vector<8x64xf32>
    %10 = tpu.matmul %5, %9, %cst_9 {dimension_numbers = #tpu.dot_dimension_numbers<[1], [0], [0], [1], [0, 0, 1, 1], [], []>} : vector<8x16xf32>, vector<16x64xf32>, vector<8x64xf32> -> vector<8x64xf32>
    %c0_10 = arith.constant 0 : index
    %c0_11 = arith.constant 0 : index
    %11 = vector.load %arg7[%c0_10, %c0_11] : memref<12x64xf32, #tpu.memory_space<vmem>>, vector<12x64xf32>
    %cst_12 = arith.constant dense<0.000000e+00> : vector<8x64xf32>
    %12 = tpu.matmul %8, %11, %cst_12 {dimension_numbers = #tpu.dot_dimension_numbers<[1], [0], [0], [1], [0, 0, 1, 1], [], []>} : vector<8x12xf32>, vector<12x64xf32>, vector<8x64xf32> -> vector<8x64xf32>
    %13 = arith.addf %10, %12 : vector<8x64xf32>
    %c0_13 = arith.constant 0 : index
    %c0_14 = arith.constant 0 : index
    %14 = vector.load %arg8[%c0_13, %c0_14] : memref<1x64xf32, #tpu.memory_space<vmem>>, vector<1x64xf32>
    %15 = vector.broadcast %14 : vector<1x64xf32> to vector<8x64xf32>
    %16 = arith.addf %13, %15 : vector<8x64xf32>
    %cst_15 = arith.constant 0.000000e+00 : f32
    %17 = vector.broadcast %cst_15 : f32 to vector<8x64xf32>
    %18 = arith.maximumf %16, %17 : vector<8x64xf32>
    %c0_16 = arith.constant 0 : index
    %c0_17 = arith.constant 0 : index
    %19 = vector.load %arg9[%c0_16, %c0_17] : memref<64x32xf32, #tpu.memory_space<vmem>>, vector<64x32xf32>
    %cst_18 = arith.constant dense<0.000000e+00> : vector<8x32xf32>
    %20 = tpu.matmul %18, %19, %cst_18 {dimension_numbers = #tpu.dot_dimension_numbers<[1], [0], [0], [1], [0, 0, 1, 1], [], []>} : vector<8x64xf32>, vector<64x32xf32>, vector<8x32xf32> -> vector<8x32xf32>
    %c0_19 = arith.constant 0 : index
    %c0_20 = arith.constant 0 : index
    %21 = vector.load %arg10[%c0_19, %c0_20] : memref<1x32xf32, #tpu.memory_space<vmem>>, vector<1x32xf32>
    %22 = vector.broadcast %21 : vector<1x32xf32> to vector<8x32xf32>
    %23 = arith.addf %20, %22 : vector<8x32xf32>
    %cst_21 = arith.constant 0.000000e+00 : f32
    %24 = vector.broadcast %cst_21 : f32 to vector<8x32xf32>
    %25 = arith.maximumf %23, %24 : vector<8x32xf32>
    %c0_22 = arith.constant 0 : index
    %c0_23 = arith.constant 0 : index
    %26 = vector.load %arg11[%c0_22, %c0_23] : memref<32x3xf32, #tpu.memory_space<vmem>>, vector<32x3xf32>
    %cst_24 = arith.constant dense<0.000000e+00> : vector<8x3xf32>
    %27 = tpu.matmul %25, %26, %cst_24 {dimension_numbers = #tpu.dot_dimension_numbers<[1], [0], [0], [1], [0, 0, 1, 1], [], []>} : vector<8x32xf32>, vector<32x3xf32>, vector<8x3xf32> -> vector<8x3xf32>
    %c0_25 = arith.constant 0 : index
    %c0_26 = arith.constant 0 : index
    %28 = vector.load %arg12[%c0_25, %c0_26] : memref<1x3xf32, #tpu.memory_space<vmem>>, vector<1x3xf32>
    %29 = vector.broadcast %28 : vector<1x3xf32> to vector<8x3xf32>
    %30 = arith.addf %27, %29 : vector<8x3xf32>
    %cst_27 = arith.constant dense<0xFF800000> : vector<8xf32>
    %31 = vector.multi_reduction <maximumf>, %30, %cst_27 [1] : vector<8x3xf32> to vector<8xf32>
    %32 = vector.shape_cast %31 : vector<8xf32> to vector<8x1xf32>
    %33 = vector.broadcast %32 : vector<8x1xf32> to vector<8x3xf32>
    %34 = arith.subf %30, %33 : vector<8x3xf32>
    %35 = math.exp %34 : vector<8x3xf32>
    %cst_28 = arith.constant dense<0.000000e+00> : vector<8xf32>
    %36 = vector.multi_reduction <add>, %35, %cst_28 [1] : vector<8x3xf32> to vector<8xf32>
    %37 = vector.shape_cast %36 : vector<8xf32> to vector<8x1xf32>
    %38 = tpu.reciprocal %37 {approx = true} : vector<8x1xf32> -> vector<8x1xf32>
    %39 = vector.broadcast %38 : vector<8x1xf32> to vector<8x3xf32>
    %40 = arith.mulf %35, %39 : vector<8x3xf32>
    %c0_29 = arith.constant 0 : index
    %c0_30 = arith.constant 0 : index
    %41 = vector.load %arg1[%c0_29, %c0_30] : memref<8x768xbf16, #tpu.memory_space<vmem>>, vector<8x768xbf16>
    %c0_31 = arith.constant 0 : index
    %c0_32 = arith.constant 0 : index
    %42 = vector.load %arg13[%c0_31, %c0_32] : memref<30x768xbf16, #tpu.memory_space<vmem>>, vector<30x768xbf16>
    %cst_33 = arith.constant dense<0.000000e+00> : vector<8x30xf32>
    %43 = tpu.matmul %41, %42, %cst_33 {dimension_numbers = #tpu.dot_dimension_numbers<[1], [1], [0], [0], [0, 0, 1, 0], [], []>} : vector<8x768xbf16>, vector<30x768xbf16>, vector<8x30xf32> -> vector<8x30xf32>
    %c0_34 = arith.constant 0 : index
    %c0_35 = arith.constant 0 : index
    %44 = vector.load %arg14[%c0_34, %c0_35] : memref<1x30xf32, #tpu.memory_space<vmem>>, vector<1x30xf32>
    %45 = vector.broadcast %44 : vector<1x30xf32> to vector<8x30xf32>
    %46 = arith.addf %43, %45 : vector<8x30xf32>
    %47 = vector.extract_strided_slice %40 {offsets = [0, 0], sizes = [8, 1], strides = [1, 1]} : vector<8x3xf32> to vector<8x1xf32>
    %48 = vector.extract_strided_slice %46 {offsets = [0, 0], sizes = [8, 10], strides = [1, 1]} : vector<8x30xf32> to vector<8x10xf32>
    %49 = vector.broadcast %47 : vector<8x1xf32> to vector<8x10xf32>
    %50 = arith.mulf %49, %48 : vector<8x10xf32>
    %51 = vector.extract_strided_slice %40 {offsets = [0, 1], sizes = [8, 1], strides = [1, 1]} : vector<8x3xf32> to vector<8x1xf32>
    %52 = vector.extract_strided_slice %46 {offsets = [0, 10], sizes = [8, 10], strides = [1, 1]} : vector<8x30xf32> to vector<8x10xf32>
    %53 = vector.broadcast %51 : vector<8x1xf32> to vector<8x10xf32>
    %54 = arith.mulf %53, %52 : vector<8x10xf32>
    %55 = arith.addf %50, %54 : vector<8x10xf32>
    %56 = vector.extract_strided_slice %40 {offsets = [0, 2], sizes = [8, 1], strides = [1, 1]} : vector<8x3xf32> to vector<8x1xf32>
    %57 = vector.extract_strided_slice %46 {offsets = [0, 20], sizes = [8, 10], strides = [1, 1]} : vector<8x30xf32> to vector<8x10xf32>
    %58 = vector.broadcast %56 : vector<8x1xf32> to vector<8x10xf32>
    %59 = arith.mulf %58, %57 : vector<8x10xf32>
    %60 = arith.addf %55, %59 : vector<8x10xf32>
    %cst_36 = arith.constant 0.000000e+00 : f32
    %61 = vector.broadcast %cst_36 : f32 to vector<8x118xf32>
    %62 = tpu.concatenate %60, %61 in 1 : vector<8x10xf32>, vector<8x118xf32> -> vector<8x128xf32>
    %c0_37 = arith.constant 0 : index
    %c0_38 = arith.constant 0 : index
    %63 = vector.load %arg15[%c0_37, %c0_38] : memref<8x128xf32, #tpu.memory_space<vmem>>, vector<8x128xf32>
    tpu.vector_store %arg15[%c0_37, %c0_38], %62 {strides = array<i32>} : memref<8x128xf32, #tpu.memory_space<vmem>>, vector<8x128xf32>,
    return
  }
  func.func @transform_0(%arg0: i32) -> (i32, i32) {
    %c0_i32 = arith.constant 0 : i32
    %c0_i32_0 = arith.constant 0 : i32
    return %arg0, %c0_i32 : i32, i32
  }
  func.func @transform_1(%arg0: i32) -> (i32, i32) {
    %c0_i32 = arith.constant 0 : i32
    %c0_i32_0 = arith.constant 0 : i32
    return %arg0, %c0_i32 : i32, i32
  }
  func.func @transform_2(%arg0: i32) -> (i32, i32) {
    %c0_i32 = arith.constant 0 : i32
    %c0_i32_0 = arith.constant 0 : i32
    %c0_i32_1 = arith.constant 0 : i32
    return %c0_i32, %c0_i32_0 : i32, i32
  }
  func.func @transform_3(%arg0: i32) -> (i32, i32) {
    %c0_i32 = arith.constant 0 : i32
    %c0_i32_0 = arith.constant 0 : i32
    %c0_i32_1 = arith.constant 0 : i32
    return %c0_i32, %c0_i32_0 : i32, i32
  }
  func.func @transform_4(%arg0: i32) -> (i32, i32) {
    %c0_i32 = arith.constant 0 : i32
    %c0_i32_0 = arith.constant 0 : i32
    %c0_i32_1 = arith.constant 0 : i32
    return %c0_i32, %c0_i32_0 : i32, i32
  }
  func.func @transform_5(%arg0: i32) -> (i32, i32) {
    %c0_i32 = arith.constant 0 : i32
    %c0_i32_0 = arith.constant 0 : i32
    %c0_i32_1 = arith.constant 0 : i32
    return %c0_i32, %c0_i32_0 : i32, i32
  }
  func.func @transform_6(%arg0: i32) -> (i32, i32) {
    %c0_i32 = arith.constant 0 : i32
    %c0_i32_0 = arith.constant 0 : i32
    %c0_i32_1 = arith.constant 0 : i32
    return %c0_i32, %c0_i32_0 : i32, i32
  }
  func.func @transform_7(%arg0: i32) -> (i32, i32) {
    %c0_i32 = arith.constant 0 : i32
    %c0_i32_0 = arith.constant 0 : i32
    %c0_i32_1 = arith.constant 0 : i32
    return %c0_i32, %c0_i32_0 : i32, i32
  }
  func.func @transform_8(%arg0: i32) -> (i32, i32) {
    %c0_i32 = arith.constant 0 : i32
    %c0_i32_0 = arith.constant 0 : i32
    %c0_i32_1 = arith.constant 0 : i32
    return %c0_i32, %c0_i32_0 : i32, i32
  }
  func.func @transform_9(%arg0: i32) -> (i32, i32) {
    %c0_i32 = arith.constant 0 : i32
    %c0_i32_0 = arith.constant 0 : i32
    %c0_i32_1 = arith.constant 0 : i32
    return %c0_i32, %c0_i32_0 : i32, i32
  }
  func.func @transform_10(%arg0: i32) -> (i32, i32) {
    %c0_i32 = arith.constant 0 : i32
    %c0_i32_0 = arith.constant 0 : i32
    %c0_i32_1 = arith.constant 0 : i32
    return %c0_i32, %c0_i32_0 : i32, i32
  }
  func.func @transform_11(%arg0: i32) -> (i32, i32) {
    %c0_i32 = arith.constant 0 : i32
    %c0_i32_0 = arith.constant 0 : i32
    %c0_i32_1 = arith.constant 0 : i32
    return %c0_i32, %c0_i32_0 : i32, i32
  }
  func.func @transform_12(%arg0: i32) -> (i32, i32) {
    %c0_i32 = arith.constant 0 : i32
    %c0_i32_0 = arith.constant 0 : i32
    %c0_i32_1 = arith.constant 0 : i32
    return %c0_i32, %c0_i32_0 : i32, i32
  }
  func.func @transform_13(%arg0: i32) -> (i32, i32) {
    %c0_i32 = arith.constant 0 : i32
    %c0_i32_0 = arith.constant 0 : i32
    %c0_i32_1 = arith.constant 0 : i32
    return %c0_i32, %c0_i32_0 : i32, i32
  }
  func.func @transform_14(%arg0: i32) -> (i32, i32) {
    %c0_i32 = arith.constant 0 : i32
    %c0_i32_0 = arith.constant 0 : i32
    return %arg0, %c0_i32 : i32, i32
  }
}

</mosaic_0001>

<bundles_post_ra>
// kernel: tpu_custom_call.1
= control target key start
LH: loop header
LB: loop body
LE: loop exit
PB: predicated region body
PF: predicated region fallthrough
CT: control target
= control target key end

     0   :  { %19 = vsyncpa [#allocation3], 0  ;;  %s1782_s0 = inlined_call_operand.hbm [shape: bf16[8,768], index: 0, kind: input, shape index: {}]   ;;  %s1783_s1 = inlined_call_operand.hbm [shape: bf16[8,2048], index: 1, kind: input, shape index: {}]   ;;  %s1784_s2 = inlined_call_operand.vmem [shape: f32[1,12], index: 2, kind: input, shape index: {}]   ;;  %s1785_s3 = inlined_call_operand.vmem [shape: bf16[16,2048], index: 3, kind: input, shape index: {}]   ;;  %s1786_s4 = inlined_call_operand.vmem [shape: f32[1,16], index: 4, kind: input, shape index: {}]   ;;  %s1787_s5 = inlined_call_operand.hbm [shape: f32[16,64], index: 5, kind: input, shape index: {}]   ;;  %s1788_s6 = inlined_call_operand.hbm [shape: f32[12,64], index: 6, kind: input, shape index: {}]   ;;  %s1789_s7 = inlined_call_operand.vmem [shape: f32[1,64], index: 7, kind: input, shape index: {}]   ;;  %s1790_s8 = inlined_call_operand.vmem [shape: f32[64,32], index: 8, kind: input, shape index: {}]   ;;  %s1791_s9 = inlined_call_operand.vmem [shape: f32[1,32], index: 9, kind: input, shape index: {}]   ;;  %s1792_s10 = inlined_call_operand.vmem [shape: f32[32,3], index: 10, kind: input, shape index: {}]   ;;  %s1793_s11 = inlined_call_operand.vmem [shape: f32[1,3], index: 11, kind: input, shape index: {}]   ;;  %s1794_s12 = inlined_call_operand.hbm [shape: bf16[30,768], index: 12, kind: input, shape index: {}]   ;;  %s1795_s13 = inlined_call_operand.vmem [shape: f32[1,30], index: 13, kind: input, shape index: {}]   ;;  %s1796_s14 = inlined_call_operand.hbm [shape: f32[8,128], index: 14, kind: output, shape index: {}]  }
   0x1   :  { %20 = vsyncpa [#allocation6], 0 }
   0x2   :  { %21 = vsyncpa [#allocation9], 0 }
   0x3   :  { %22 = vsyncpa [#allocation4], 0  ;;  %s1544_s29 = smov [#allocation5]  }
   0x4   :  { %s39_s30 = sshll.u32 %s1544_s29, 4  ;;  %s40_s30 = int_to_ptr.vmem [resolvable:$true] %s39_s30 }
   0x5   :  { %s1424_s15 = scalar_lea.vmem %s40_s30, 1024  ;;  %p1429_p1 = scmp.lt.s32.totalorder %s40_s30, %s40_s30 }
   0x6   :  { %p1425_p0 = scmp.ne.s32.totalorder %s40_s30, %s1424_s15  ;;  %p1430_p2 = scmp.lt.s32.totalorder %s1424_s15, %s1424_s15 }
   0x8   :  { %p1431_p3 = por %p1430_p2, %p1429_p1 }
   0xa   :  { %p1432_p4 = pnand %p1431_p3, %p1425_p0 }
   0xc   :  { %1435 = shalt.err (!%p1432_p4)
}
   0xd   :  { %42 = dma.hbm_to_vmem [thread:$0]  %s1783_s1, 1024, %s40_s30, [#allocation6]  }
   0xe   :  { %s1545_s18 = smov [#allocation8]   ;;  %s1546_s20 = smov [#allocation2]  }
   0xf   :  { %s66_s19 = sshll.u32 %s1545_s18, 4  ;;  %s29_s21 = sshll.u32 %s1546_s20, 4  ;;  %s67_s19 = int_to_ptr.vmem [resolvable:$true] %s66_s19  ;;  %s30_s21 = int_to_ptr.vmem [resolvable:$true] %s29_s21 }
  0x10   :  { %s1444_s22 = scalar_lea.vmem %s67_s19, 256  ;;  %p1449_p6 = scmp.lt.s32.totalorder %s67_s19, %s67_s19 }
  0x11   :  { %p1445_p5 = scmp.ne.s32.totalorder %s67_s19, %s1444_s22  ;;  %p1450_p7 = scmp.lt.s32.totalorder %s1444_s22, %s1444_s22 }
  0x13   :  { %p1451_p8 = por %p1450_p7, %p1449_p6 }
  0x15   :  { %p1452_p9 = pnand %p1451_p8, %p1445_p5 }
  0x17   :  { %1455 = shalt.err (!%p1452_p9)
}
  0x18   :  { %s1547_s23 = smov 128   ;;  %s1548_s24 = smov 8  }
  0x19   :  { %72 = dma.hbm_to_vmem [thread:$0]  %s1788_s6, 256, %s67_s19, [#allocation9], %s1547_s23, %s1547_s23, %s1548_s24  }
  0x1a   :  { %s1464_s1 = scalar_lea.vmem %s30_s21, 384  ;;  %p1469_p11 = scmp.lt.s32.totalorder %s30_s21, %s30_s21 }
  0x1b   :  { %p1465_p10 = scmp.ne.s32.totalorder %s30_s21, %s1464_s1  ;;  %p1470_p12 = scmp.lt.s32.totalorder %s1464_s1, %s1464_s1 }
  0x1d   :  { %p1471_p13 = por %p1470_p12, %p1469_p11 }
  0x1f   :  { %p1472_p0 = pnand %p1471_p13, %p1465_p10 }
  0x21   :  { %1475 = shalt.err (!%p1472_p0)
}
  0x22   :  { %32 = dma.hbm_to_vmem [thread:$0]  %s1782_s0, 384, %s30_s21, [#allocation3]  }
  0x23   :  { %s1549_s29 = smov [#allocation7]   ;;  %s1550_s15 = smov [#allocation10]  }
  0x24   :  { %s54_s30 = sshll.u32 %s1549_s29, 4  ;;  %s88_s16 = sshll.u32 %s1550_s15, 4  ;;  %s55_s30 = int_to_ptr.vmem [resolvable:$true] %s54_s30  ;;  %s89_s16 = int_to_ptr.vmem [resolvable:$true] %s88_s16 }
  0x25   :  { %s1484_s17 = scalar_lea.vmem %s55_s30, 256  ;;  %p1489_p2 = scmp.lt.s32.totalorder %s55_s30, %s55_s30 }
  0x26   :  { %p1485_p1 = scmp.ne.s32.totalorder %s55_s30, %s1484_s17  ;;  %p1490_p3 = scmp.lt.s32.totalorder %s1484_s17, %s1484_s17 }
  0x28   :  { %p1491_p4 = por %p1490_p3, %p1489_p2 }
  0x2a   :  { %p1492_p5 = pnand %p1491_p4, %p1485_p1 }
  0x2c   :  { %1495 = shalt.err (!%p1492_p5)
}
  0x2d   :  { %60 = dma.hbm_to_vmem [thread:$0]  %s1787_s5, 256, %s55_s30, [#allocation6], %s1547_s23, %s1547_s23, %s1548_s24  }
  0x2e   :  { %s1504_s19 = scalar_lea.vmem %s89_s16, 1536  ;;  %p1509_p7 = scmp.lt.s32.totalorder %s89_s16, %s89_s16 }
  0x2f   :  { %p1505_p6 = scmp.ne.s32.totalorder %s89_s16, %s1504_s19  ;;  %p1510_p8 = scmp.lt.s32.totalorder %s1504_s19, %s1504_s19 }
  0x31   :  { %p1511_p9 = por %p1510_p8, %p1509_p7 }
  0x33   :  { %p1512_p10 = pnand %p1511_p9, %p1505_p6 }
  0x35   :  { %1515 = shalt.err (!%p1512_p10)
}
  0x36   :  { %s1551_s0 = smov 384   ;;  %s1552_s20 = smov 24  }
  0x37   :  { %94 = dma.hbm_to_vmem [thread:$0]  %s1794_s12, 1536, %s89_s16, [#allocation9], %s1551_s0, %s1551_s0, %s1552_s20  }
  0x38   :  { %1536 = dma.done.wait [#allocation3], 384  }
  0x39   :  { %1537 = vsyncadd [#allocation3], 4294966912 }
  0x3a   :  { %1538 = dma.done.wait [#allocation6], 1280  }
  0x3b   :  { %1539 = vsyncadd [#allocation6], 4294966016 }
  0x3c   :  { %1540 = dma.done.wait [#allocation9], 1792  }
  0x3d   :  { %1541 = vsyncadd [#allocation9], 4294965504  ;;  %v121_v0 = vld [vmem:[%s1785_s3] sm:$0xff]  ;;  %v122_v2 = vld [vmem:[%s1785_s3 + $0x8] sm:$0xff]  ;;  %vm613_vm0 = vcmask 1043456   ;;  %v1553_v57 = vmov 0.0  }
  0x3e   :  { %v129_v1 = vld [vmem:[%s1785_s3 + $0x40] sm:$0xff]  ;;  %v130_v4 = vld [vmem:[%s1785_s3 + $0x48] sm:$0xff]  ;;  %v113_v6 = vld [vmem:[#allocation5] sm:$0xff]  ;;  %vm1554_vm1 = vmmov 0   ;;  %vm610_vm2 = vcmask 97280   ;;  %vm687_vm3 = vcmask 130048  }
  0x3f   :  { %v1244_v3 = vcombine.high %v121_v0, %v129_v1  ;;  %v1243_v5 = vcombine.low %v121_v0, %v129_v1  ;;  %v114_v7 = vld [vmem:[#allocation5 + $0x8] sm:$0xff]  ;;  %v1246_v8 = vcombine.high %v122_v2, %v130_v4  ;;  %v1245_v9 = vcombine.low %v122_v2, %v130_v4  ;;  %v123_v11 = vld [vmem:[%s1785_s3 + $0x10] sm:$0xff]  ;;  %v124_v13 = vld [vmem:[%s1785_s3 + $0x18] sm:$0xff]  ;;  %s1560_s19 = smov [#allocation11]  }
  0x40   :  { %v1228_v10 = vcombine.high %v113_v6, %v113_v6  ;;  %v131_v12 = vld [vmem:[%s1785_s3 + $0x50] sm:$0xff]  ;;  %v1230_v14 = vcombine.high %v114_v7, %v114_v7  ;;  %v132_v16 = vld [vmem:[%s1785_s3 + $0x58] sm:$0xff]  ;;  %v115_v18 = vld [vmem:[#allocation5 + $0x10] sm:$0xff]  ;;  %v1227_v20 = vcombine.low %v113_v6, %v113_v6  ;;  %v1229_v24 = vcombine.low %v114_v7, %v114_v7  ;;  %s1215_s0 = sshll.u32 %s1560_s19, 4  ;;  %s1216_s0 = int_to_ptr.vmem [resolvable:$true] %s1215_s0 }
  0x41   :  { %294 = vmatprep.subr.bf16.mxu0 %v1244_v3  ;;  %v1248_v15 = vcombine.high %v123_v11, %v131_v12  ;;  %334 = vmatprep.subr.bf16.mxu1 %v1246_v8  ;;  %v1250_v17 = vcombine.high %v124_v13, %v132_v16  ;;  %v116_v19 = vld [vmem:[#allocation5 + $0x18] sm:$0xff]  ;;  %v125_v21 = vld [vmem:[%s1785_s3 + $0x20] sm:$0xff]  ;;  %v126_v23 = vld [vmem:[%s1785_s3 + $0x28] sm:$0xff]  ;;  %v1247_v25 = vcombine.low %v123_v11, %v131_v12  ;;  %vm785_vm4 = vcmask 523264   ;;  %s1516_s20 = scalar_lea.vmem %s1216_s0, 128  ;;  %p1521_p12 = scmp.lt.s32.totalorder %s1216_s0, %s1216_s0 }
  0x42   :  { %295 = vmatpush1.bf16.xpose.msra.mxu0 %v1243_v5  ;;  %335 = vmatpush1.bf16.xpose.msra.mxu1 %v1245_v9  ;;  %v133_v22 = vld [vmem:[%s1785_s3 + $0x60] sm:$0xff]  ;;  %v134_v26 = vld [vmem:[%s1785_s3 + $0x68] sm:$0xff]  ;;  %v1249_v27 = vcombine.low %v124_v13, %v132_v16  ;;  %v1232_v28 = vcombine.high %v115_v18, %v115_v18  ;;  %v1234_v29 = vcombine.high %v116_v19, %v116_v19  ;;  %v117_v32 = vld [vmem:[#allocation5 + $0x20] sm:$0xff]  ;;  %vm871_vm5 = vcmask 261120   ;;  %p1517_p11 = scmp.ne.s32.totalorder %s1216_s0, %s1516_s20  ;;  %p1522_p13 = scmp.lt.s32.totalorder %s1516_s20, %s1516_s20 }
  0x43   :  { %312 = vmatprep.mubr.bf16.mxu0 %v1228_v10  ;;  %352 = vmatprep.mubr.bf16.mxu1 %v1230_v14  ;;  %v1252_v30 = vcombine.high %v125_v21, %v133_v22  ;;  %v1254_v31 = vcombine.high %v126_v23, %v134_v26  ;;  %v1231_v33 = vcombine.low %v115_v18, %v115_v18  ;;  %v118_v34 = vld [vmem:[#allocation5 + $0x28] sm:$0xff]  ;;  %v127_v35 = vld [vmem:[%s1785_s3 + $0x30] sm:$0xff]  ;;  %v128_v39 = vld [vmem:[%s1785_s3 + $0x38] sm:$0xff]  ;;  %vm945_vm6 = vcmask 23552  }
  0x44   :  { %374 = vmatprep.subr.bf16.mxu0 %v1248_v15  ;;  %414 = vmatprep.subr.bf16.mxu1 %v1250_v17  ;;  %v135_v36 = vld [vmem:[%s1785_s3 + $0x70] sm:$0xff]  ;;  %v1233_v37 = vcombine.low %v116_v19, %v116_v19  ;;  %v1251_v38 = vcombine.low %v125_v21, %v133_v22  ;;  %v136_v40 = vld [vmem:[%s1785_s3 + $0x78] sm:$0xff]  ;;  %v1253_v41 = vcombine.low %v126_v23, %v134_v26  ;;  %v119_v46 = vld [vmem:[#allocation5 + $0x30] sm:$0xff]  ;;  %vm1206_vm7 = vcmask 80896   ;;  %p1523_p0 = por %p1522_p13, %p1521_p12 }
  0x45   :  { %v1236_v42 = vcombine.high %v117_v32, %v117_v32  ;;  %v1238_v43 = vcombine.high %v118_v34, %v118_v34  ;;  %v1256_v44 = vcombine.high %v127_v35, %v135_v36  ;;  %v1258_v45 = vcombine.high %v128_v39, %v136_v40  ;;  %v120_v48 = vld [vmem:[#allocation5 + $0x38] sm:$0xff]  ;;  %v608_v58 = vld [vmem:[#allocation8] sm:$0xff]  ;;  %v1259_v59 = vld [vmem:[%s1784_s2] ss:$0 sm:$0xff] }
  0x46   :  { %v1235_v47 = vcombine.low %v117_v32, %v117_v32  ;;  %v1237_v49 = vcombine.low %v118_v34, %v118_v34  ;;  %v1255_v50 = vcombine.low %v127_v35, %v135_v36  ;;  %v1257_v51 = vcombine.low %v128_v39, %v136_v40  ;;  %v609_v56 = vld [vmem:[#allocation8 + $0x8] sm:$0xf]  ;;  %v607_v60 = vld [vmem:[#allocation7 + $0x8] sm:$0xff]  ;;  %v606_v61 = vld [vmem:[#allocation7] sm:$0xff]  ;;  %p1524_p1 = pnand %p1523_p0, %p1517_p11 }
  0x47   :  { %v1240_v52 = vcombine.high %v119_v46, %v119_v46  ;;  %v1242_v53 = vcombine.high %v120_v48, %v120_v48  ;;  %v1239_v54 = vcombine.low %v119_v46, %v119_v46  ;;  %v1241_v55 = vcombine.low %v120_v48, %v120_v48  ;;  %v1226_v2 = vld [vmem:[%s1786_s4] ss:$0 sm:$0xff]  ;;  %v777_v35 = vld [vmem:[%s1790_s8 + $0x38] sm:$0xff]  ;;  %v772_v46 = vld [vmem:[%s1790_s8 + $0x10] sm:$0xff] }
  0x48   :  { %v770_v48 = vld [vmem:[%s1790_s8] sm:$0xff] }
  0x49   :  { %313 = vmatmul.mubr.bf16.vlgmr.msra.gmra.mxu0 %v1227_v20  ;;  %353 = vmatmul.mubr.bf16.vlgmr.msra.gmra.mxu1 %v1229_v24 }
  0x4a   :  { %375 = vmatpush1.bf16.xpose.msra.mxu0 %v1247_v25  ;;  %415 = vmatpush1.bf16.xpose.msra.mxu1 %v1249_v27 }
  0x4b   :  { %392 = vmatprep.mubr.bf16.mxu0 %v1232_v28  ;;  %432 = vmatprep.mubr.bf16.mxu1 %v1234_v29 }
  0x4c   :  { %454 = vmatprep.subr.bf16.mxu0 %v1252_v30  ;;  %494 = vmatprep.subr.bf16.mxu1 %v1254_v31 }
  0x51   :  { %393 = vmatmul.mubr.bf16.vlgmr.msra.gmra.mxu0 %v1231_v33  ;;  %433 = vmatmul.mubr.bf16.vlgmr.msra.gmra.mxu1 %v1233_v37 }
  0x52   :  { %455 = vmatpush1.bf16.xpose.msra.mxu0 %v1251_v38  ;;  %495 = vmatpush1.bf16.xpose.msra.mxu1 %v1253_v41  ;;  %v776_v38 = vld [vmem:[%s1790_s8 + $0x30] sm:$0xff]  ;;  %v775_v41 = vld [vmem:[%s1790_s8 + $0x28] sm:$0xff] }
  0x53   :  { %472 = vmatprep.mubr.bf16.mxu0 %v1236_v42  ;;  %512 = vmatprep.mubr.bf16.mxu1 %v1238_v43  ;;  %v774_v42 = vld [vmem:[%s1790_s8 + $0x20] sm:$0xff] }
  0x54   :  { %534 = vmatprep.subr.bf16.mxu0 %v1256_v44  ;;  %574 = vmatprep.subr.bf16.mxu1 %v1258_v45  ;;  %v773_v45 = vld [vmem:[%s1790_s8 + $0x18] sm:$0xff] }
  0x59   :  { %473 = vmatmul.mubr.bf16.vlgmr.msra.gmra.mxu0 %v1235_v47  ;;  %513 = vmatmul.mubr.bf16.vlgmr.msra.gmra.mxu1 %v1237_v49  ;;  %v771_v47 = vld [vmem:[%s1790_s8 + $0x8] sm:$0xff]  ;;  %v863_v49 = vld [vmem:[%s1792_s10 + $0x18] sm:$0xff] }
  0x5a   :  { %535 = vmatpush1.bf16.xpose.msra.mxu0 %v1255_v50  ;;  %575 = vmatpush1.bf16.xpose.msra.mxu1 %v1257_v51  ;;  %v1263_v51 = vld [vmem:[%s1789_s7] ss:$0 sm:$0xff] }
  0x5b   :  { %552 = vmatprep.mubr.bf16.mxu0 %v1240_v52  ;;  %592 = vmatprep.mubr.bf16.mxu1 %v1242_v53 }
  0x5c   :  { %1307 = vmatprep.subr.mxu0 %v1553_v57  ;;  %1340 = vmatprep.subr.mxu1 %v1553_v57 }
  0x61   :  { %553 = vmatmul.mubr.bf16.vlgmr.msra.gmra.mxu0 %v1239_v54  ;;  %593 = vmatmul.mubr.bf16.vlgmr.msra.gmra.mxu1 %v1241_v55 }
  0x62   :  { %1308 = vmatpush3.msk.msra.mxu0 %vm613_vm0, %v609_v56  ;;  %1311 = vmatprep.mubr.msk.f32.mxu0 %vm1554_vm1, %v1553_v57  ;;  %v862_v56 = vld [vmem:[%s1792_s10 + $0x10] sm:$0xff] }
  0x63   :  { %1309 = vmatprep.subr.mxu0 %v1553_v57  ;;  %1348 = vmatprep.mubr.msk.f32.mxu1 %vm1554_vm1, %v1553_v57 }
  0x64   :  { %1310 = vmatpush3.msra.mxu0 %v608_v58  ;;  %1341 = vmatpush3.msra.mxu1 %v863_v49  ;;  %v861_v58 = vld [vmem:[%s1792_s10 + $0x8] sm:$0xff] }
  0x65   :  { %1314 = vmatprep.subr.mxu0 %v1553_v57  ;;  %1342 = vmatprep.subr.mxu1 %v1553_v57 }
  0x66   :  { %1343 = vmatpush3.msra.mxu1 %v862_v56 }
  0x67   :  { %1344 = vmatprep.subr.mxu1 %v1553_v57 }
  0x68   :  { %1345 = vmatpush3.msra.mxu1 %v861_v58 }
  0x69   :  { %1312 = vmatmul.mubr.msk.f32.vlgmr.msra.gmra.mxu0 %vm610_vm2, %v1259_v59  ;;  %v860_v59 = vld [vmem:[%s1792_s10] sm:$0xff]  ;;  %1346 = vmatprep.subr.mxu1 %v1553_v57 }
  0x6a   :  { %1318 = vmatprep.mubr.msk.f32.mxu0 %vm1554_vm1, %v1553_v57  ;;  %1315 = vmatpush3.msra.mxu0 %v607_v60  ;;  %v1264_v60 = vld [vmem:[%s1791_s9] ss:$0 sm:$0xff] }
  0x6b   :  { %1316 = vmatprep.subr.mxu0 %v1553_v57  ;;  %1347 = vmatpush3.msra.mxu1 %v860_v59 }
  0x6c   :  { %1317 = vmatpush3.msra.mxu0 %v606_v61 }
  0x6d   :  { %1321 = vmatprep.subr.mxu0 %v1553_v57 }
 0x109   :  { %v314_v62 = vpop.f32.mrf.mxu0  ;;  %v354_v63 = vpop.f32.mrf.mxu1 }
 0x10a   :  { %v315_v6 = vadd.f32 %v1226_v2, %v314_v62 }
 0x10b   :  { %v316_v0 = vpop.f32.mrf.mxu0  ;;  %v356_v1 = vpop.f32.mrf.mxu1 }
 0x10c   :  { %v355_v11 = vadd.f32 %v354_v63, %v315_v6  ;;  %v1266_v1 = vld [vmem:[%s1793_s11] ss:$0 sm:$0xff]  ;;  %v1390_v6 = vld [vmem:[#allocation10 + $0x34] ss:$24 sps:$4 sm:$0x7f]   ;;  %s1558_s11 = smov 118  }
 0x10d   :  { %v317_v3 = vpop.f32.mrf.mxu0  ;;  %v357_v4 = vpop.f32.mrf.mxu1  ;;  %1072 = vmatprep.subr.bf16.mxu1 %v1390_v6 }
 0x10f   :  { %v318_v5 = vpop.f32.mrf.mxu0  ;;  %v358_v7 = vpop.f32.mrf.mxu1 }
 0x110   :  { %v1388_v5 = vld [vmem:[#allocation10 + $0x30] ss:$24 sps:$4 sm:$0x7f]   ;;  %v1393_v7 = vld [vmem:[#allocation10 + $0x4] ss:$24 sps:$4 sm:$0xff]  }
 0x111   :  { %v394_v8 = vpop.f32.mrf.mxu0  ;;  %v434_v9 = vpop.f32.mrf.mxu1 }
 0x112   :  { %v395_v14 = vadd.f32 %v394_v8, %v355_v11  ;;  %v957_v8 = vld [vmem:[#allocation2] sm:$0xff] }
 0x113   :  { %v396_v10 = vpop.f32.mrf.mxu0  ;;  %v436_v12 = vpop.f32.mrf.mxu1  ;;  %v1270_v11 = vcombine.high %v957_v8, %v957_v8 }
 0x114   :  { %v435_v19 = vadd.f32 %v434_v9, %v395_v14  ;;  %v1394_v9 = vld [vmem:[#allocation10 + $0x38] ss:$24 sps:$4 sm:$0x7f]   ;;  %v1396_v10 = vld [vmem:[#allocation10 + $0x3c] ss:$24 sps:$4 sm:$0x7f]  }
 0x115   :  { %v397_v13 = vpop.f32.mrf.mxu0  ;;  %v437_v15 = vpop.f32.mrf.mxu1  ;;  %v1404_v12 = vld [vmem:[#allocation10 + $0xc] ss:$24 sps:$4 sm:$0xff]  }
 0x116   :  { %v958_v13 = vld [vmem:[#allocation2 + $0x8] sm:$0xff]  ;;  %v1391_v15 = vld [vmem:[#allocation10] ss:$24 sps:$4 sm:$0xff]  }
 0x117   :  { %v398_v16 = vpop.f32.mrf.mxu0  ;;  %v438_v17 = vpop.f32.mrf.mxu1  ;;  %v1272_v14 = vcombine.high %v958_v13, %v958_v13 }
 0x118   :  { %v1401_v16 = vld [vmem:[#allocation10 + $0x44] ss:$24 sps:$4 sm:$0x7f]   ;;  %v1402_v17 = vld [vmem:[#allocation10 + $0x8] ss:$24 sps:$4 sm:$0xff]  }
 0x119   :  { %v474_v18 = vpop.f32.mrf.mxu0  ;;  %v514_v20 = vpop.f32.mrf.mxu1 }
 0x11a   :  { %v475_v22 = vadd.f32 %v474_v18, %v435_v19  ;;  %v959_v18 = vld [vmem:[#allocation2 + $0x10] sm:$0xff]  ;;  %v1269_v19 = vcombine.low %v957_v8, %v957_v8 }
 0x11b   :  { %v476_v21 = vpop.f32.mrf.mxu0  ;;  %v516_v23 = vpop.f32.mrf.mxu1 }
 0x11c   :  { %v515_v27 = vadd.f32 %v514_v20, %v475_v22  ;;  %v1399_v20 = vld [vmem:[#allocation10 + $0x40] ss:$24 sps:$4 sm:$0x7f]   ;;  %v1274_v21 = vcombine.high %v959_v18, %v959_v18  ;;  %v1407_v22 = vld [vmem:[#allocation10 + $0x14] ss:$24 sps:$4 sm:$0xff]   ;;  %v1271_v23 = vcombine.low %v958_v13, %v958_v13 }
 0x11d   :  { %v477_v24 = vpop.f32.mrf.mxu0  ;;  %v517_v25 = vpop.f32.mrf.mxu1 }
 0x11e   :  { %v1405_v24 = vld [vmem:[#allocation10 + $0x10] ss:$24 sps:$4 sm:$0xff]   ;;  %v1273_v25 = vcombine.low %v959_v18, %v959_v18 }
 0x11f   :  { %v478_v26 = vpop.f32.mrf.mxu0  ;;  %v518_v28 = vpop.f32.mrf.mxu1 }
 0x121   :  { %v554_v29 = vpop.f32.mrf.mxu0  ;;  %v594_v31 = vpop.f32.mrf.mxu1 }
 0x122   :  { %v555_v30 = vadd.f32 %v554_v29, %v515_v27 }
 0x123   :  { %v556_v32 = vpop.f32.mrf.mxu0  ;;  %v596_v34 = vpop.f32.mrf.mxu1 }
 0x124   :  { %v595_v33 = vadd.f32 %v594_v31, %v555_v30  ;;  %v1555_v31 = vmov 1   ;;  %v1556_v32 = vmov 0  }
 0x125   :  { %v557_v36 = vpop.f32.mrf.mxu0  ;;  %v597_v37 = vpop.f32.mrf.mxu1  ;;  %1368 = vset.pattern.permute.xlu1 %v1555_v31  ;;  %1370 = vset.pattern.permute.xlu0 %v1556_v32 }
 0x126   :  { %1319 = vmatmul.mubr.msk.f32.vlgmr.msra.gmra.mxu0 %vm687_vm3, %v595_v33  ;;  %v1268_v33 = vld [vmem:[%s1795_s13] ss:$0 sm:$0xff]  ;;  %s1559_s13 = smov 108  }
 0x127   :  { %v558_v39 = vpop.f32.mrf.mxu0  ;;  %1322 = vmatpush3.msra.mxu0 %v777_v35  ;;  %1337 = vmatprep.mubr.msk.f32.mxu0 %vm1554_vm1, %v1553_v57  ;;  %v598_v40 = vpop.f32.mrf.mxu1 }
 0x128   :  { %1323 = vmatprep.subr.mxu0 %v1553_v57 }
 0x129   :  { %1324 = vmatpush3.msra.mxu0 %v776_v38  ;;  %v683_v43 = vpop.f32.mrf.mxu0 }
 0x12a   :  { %1325 = vmatprep.subr.mxu0 %v1553_v57 }
 0x12b   :  { %1326 = vmatpush3.msra.mxu0 %v775_v41  ;;  %v1313_v44 = vpop.f32.mrf.mxu0 }
 0x12c   :  { %1327 = vmatprep.subr.mxu0 %v1553_v57 }
 0x12d   :  { %1328 = vmatpush3.msra.mxu0 %v774_v42 }
 0x12e   :  { %1329 = vmatprep.subr.mxu0 %v1553_v57 }
 0x12f   :  { %1330 = vmatpush3.msra.mxu0 %v773_v45 }
 0x130   :  { %1331 = vmatprep.subr.mxu0 %v1553_v57 }
 0x131   :  { %1332 = vmatpush3.msra.mxu0 %v772_v46 }
 0x132   :  { %1333 = vmatprep.subr.mxu0 %v1553_v57 }
 0x133   :  { %1334 = vmatpush3.msra.mxu0 %v771_v47 }
 0x134   :  { %1335 = vmatprep.subr.mxu0 %v1553_v57 }
 0x135   :  { %1336 = vmatpush3.msra.mxu0 %v770_v48 }
 0x136   :  { %1112 = vmatprep.subr.bf16.mxu0 %v1396_v10 }
 0x1e6   :  { %v757_v50 = vpop.f32.mrf.mxu0 }
 0x1e7   :  { %v758_v52 = vadd.f32 %v757_v50, %v683_v43 }
 0x1e8   :  { %v1320_v53 = vpop.f32.mrf.mxu0 }
 0x1e9   :  { %v768_v54 = vadd.f32 %v1263_v51, %v758_v52  ;;  %v1557_v52 = vmov 2  }
 0x1eb   :  { %v769_v55 = vmax.f32 %v768_v54, 0.0 }
 0x1ed   :  { %1338 = vmatmul.mubr.msk.f32.vlgmr.msra.gmra.mxu0 %vm785_vm4, %v769_v55 }
 0x1ee   :  { %1113 = vmatpush1.bf16.xpose.msra.mxu0 %v1394_v9  ;;  %1132 = vmatprep.mubr.bf16.mxu0 %v1272_v14 }
 0x1ef   :  { %1114 = vmatprep.subr.bf16.mxu0 %v1404_v12 }
 0x1f6   :  { %1115 = vmatpush1.bf16.xpose.msra.mxu0 %v1402_v17 }
 0x1fd   :  { %1133 = vmatmul.mubr.bf16.vlgmr.msra.gmra.mxu0 %v1271_v23 }
 0x2ad   :  { %v855_v61 = vpop.f32.mrf.mxu0 }
 0x2ae   :  { %v856_v62 = vadd.f32 %v1264_v60, %v855_v61 }
 0x2af   :  { %v1339_v63 = vpop.f32.mrf.mxu0 }
 0x2b0   :  { %v859_v0 = vmax.f32 %v856_v62, 0.0 }
 0x2b2   :  { %1349 = vmatmul.mubr.msk.f32.vlgmr.msra.gmra.mxu1 %vm871_vm5, %v859_v0 }
 0x2b3   :  { %1073 = vmatpush1.bf16.xpose.msra.mxu1 %v1388_v5  ;;  %1092 = vmatprep.mubr.bf16.mxu1 %v1270_v11 }
 0x2b4   :  { %1074 = vmatprep.subr.bf16.mxu1 %v1393_v7 }
 0x2bb   :  { %1075 = vmatpush1.bf16.xpose.msra.mxu1 %v1391_v15 }
 0x2bc   :  { %1152 = vmatprep.subr.bf16.mxu1 %v1401_v16 }
 0x2bd   :  { %v1134_v37 = vpop.f32.mrf.mxu0 }
 0x2bf   :  { %v1136_v40 = vpop.f32.mrf.mxu0 }
 0x2c1   :  { %v1137_v42 = vpop.f32.mrf.mxu0 }
 0x2c2   :  { %1093 = vmatmul.mubr.bf16.vlgmr.msra.gmra.mxu1 %v1269_v19 }
 0x2c3   :  { %1153 = vmatpush1.bf16.xpose.msra.mxu1 %v1399_v20  ;;  %1172 = vmatprep.mubr.bf16.mxu1 %v1274_v21  ;;  %v1138_v43 = vpop.f32.mrf.mxu0 }
 0x2c4   :  { %1154 = vmatprep.subr.bf16.mxu1 %v1407_v22 }
 0x2cb   :  { %1155 = vmatpush1.bf16.xpose.msra.mxu1 %v1405_v24 }
 0x2d2   :  { %1173 = vmatmul.mubr.bf16.vlgmr.msra.gmra.mxu1 %v1273_v25 }
 0x372   :  { %v941_v2 = vpop.f32.mrf.mxu1 }
 0x373   :  { %v942_v3 = vadd.f32 %v1266_v1, %v941_v2 }
 0x374   :  { %v1350_v4 = vpop.f32.mrf.mxu1 }
 0x375   :  { %v946_v57 = vsel %vm945_vm6, %v942_v3, -inf }
 0x376   :  { %947 = vmax.xlane.f32.xlu0 %v946_v57 }
 0x382   :  { %v1094_v34 = vpop.f32.mrf.mxu1 }
 0x383   :  { %v1095_v35 = vadd.f32 %v1268_v33, %v1094_v34 }
 0x384   :  { %v1096_v36 = vpop.f32.mrf.mxu1 }
 0x385   :  { %v1135_v38 = vadd.f32 %v1134_v37, %v1095_v35 }
 0x386   :  { %v1097_v39 = vpop.f32.mrf.mxu1 }
 0x388   :  { %v1098_v41 = vpop.f32.mrf.mxu1 }
 0x392   :  { %v1174_v44 = vpop.f32.mrf.mxu1 }
 0x393   :  { %v1175_v45 = vadd.f32 %v1174_v44, %v1135_v38 }
 0x394   :  { %v1176_v46 = vpop.f32.mrf.mxu1 }
 0x396   :  { %v1177_v47 = vpop.f32.mrf.mxu1 }
 0x398   :  { %v1178_v48 = vpop.f32.mrf.mxu1 }
 0x3ff   :  { %v948_v26 = vpop.xlane.xlu0 %947 }
 0x400   :  { %v949_v27 = vsub.f32 %v942_v3, %v948_v26 }
 0x402   :  { %v950_v28 = vmul.f32 1.442695, %v949_v27 }
 0x404   :  { %1412 = vpow2.f32 %v950_v28 }
 0x411   :  { %v1413_v29 = vpop.eup %1412 }
 0x412   :  { %v952_v30 = vsel %vm945_vm6, %v1413_v29, 0.0 }
 0x413   :  { %953 = vadd.xlane.f32.xlu0 %v952_v30 }
 0x49c   :  { %v954_v49 = vpop.xlane.xlu0 %953 }
 0x49d   :  { %1414 = vrcp.f32 %v954_v49 }
 0x4aa   :  { %v1415_v50 = vpop.eup %1414 }
 0x4ab   :  { %v956_v51 = vmul.f32 %v1415_v50, %v1413_v29 }
 0x4ad   :  { %1182 = vperm.xlu0 %1370, %v956_v51   ;;  %1187 = vperm.xlu1 %1368, %v956_v51  }
 0x4b1   :  { %1369 = vset.pattern.permute.xlu1 %v1557_v52  ;;  %1371 = vset.pattern.permute.xlu0 %v1557_v52 }
 0x4b2   :  { %1197 = vperm.xlu1 %1369, %v956_v51  }
 0x528   :  { %v1188_v53 = vpop.permute.xlu1 %1187  ;;  %v1183_v58 = vpop.permute.xlu0 %1182 }
 0x529   :  { %v1190_v54 = vmul.f32 %v1188_v53, %v1175_v45  ;;  %v1185_v60 = vmul.f32 %v1183_v58, %v1175_v45 }
 0x52b   :  { %1192 = vrot.lane.b32.xlu1 %v1190_v54, %s1558_s11 }
 0x52d   :  { %v1198_v55 = vpop.permute.xlu1 %1197 }
 0x52e   :  { %v1200_v56 = vmul.f32 %v1198_v55, %v1175_v45 }
 0x530   :  { %1202 = vrot.lane.b32.xlu1 %v1200_v56, %s1559_s13 }
 0x59d   :  { %v1193_v59 = vpop.permute.xlu1 %1192 }
 0x59e   :  { %v1195_v61 = vadd.f32 %v1193_v59, %v1185_v60 }
 0x5a2   :  { %v1203_v62 = vpop.permute.xlu1 %1202 }
 0x5a3   :  { %v1205_v63 = vadd.f32 %v1203_v62, %v1195_v61 }
 0x5a5   :  { %v1207_v0 = vsel %vm1206_vm7, %v1205_v63, 0.0 }
 0x5a6   :  { %1208 = vst [vmem:[#allocation11] sm:$0xff] %v1207_v0 }
 0x5a7   :  { %1527 = shalt.err (!%p1524_p1)
}
 0x5a8   :  { %1218 = dma.vmem_to_hbm [thread:$0]  %s1216_s0, 128, %s1796_s14, [#allocation4]  }
 0x5a9   :  { %1542 = dma.done.wait [#allocation4], 128  }
 0x5aa   :  { %1543 = vsyncadd [#allocation4], 4294967168 }
 0x5ab   :  { %1222 = vsyncpa [#allocation3], 1 }
 0x5ac   :  { %1223 = vsyncpa [#allocation6], 1 }
 0x5ad   :  { %1224 = vsyncpa [#allocation9], 1 }
 0x5ae   :  { %1225 = vsyncpa [#allocation4], 1 }

</bundles_post_ra>
